<compile_context>
chip_gen: v5e
topology: v5e:2x2
jax: 0.10.0
libtpu: 0.0.40
codegen_flags: <defaults>
</compile_context>

<pallas_src>
import functools

import jax
import jax.numpy as jnp
from jax.experimental import pallas as pl
from jax.experimental.pallas import tpu as pltpu


def _replication_pad2d_kernel(x_ref, o_ref, *, padding):
    left, right, top, bottom = padding

    x = x_ref[...]                     # (T, H, W)
    T, H, W = x.shape
    W_out = W + left + right

    # Horizontal (lane-axis) replication: build full-width rows in registers.
    pieces = []
    if left > 0:
        pieces.append(jnp.broadcast_to(x[:, :, :1], (T, H, left)))
    pieces.append(x)
    if right > 0:
        pieces.append(jnp.broadcast_to(x[:, :, W - 1:W], (T, H, right)))
    rows = jnp.concatenate(pieces, axis=-1) if len(pieces) > 1 else x  # (T, H, W_out)

    # Vertical (sublane-axis) replication, built from `rows` (corners included).
    pieces = []
    if top > 0:
        pieces.append(jnp.broadcast_to(rows[:, :1, :], (T, top, W_out)))
    pieces.append(rows)
    if bottom > 0:
        pieces.append(jnp.broadcast_to(rows[:, H - 1:H, :], (T, bottom, W_out)))
    full = jnp.concatenate(pieces, axis=-2) if len(pieces) > 1 else rows

    # Single dense, unmasked (full-block) store.
    o_ref[...] = full


def replication_pad2d(x, padding):
    """Pallas TPU implementation of torch.nn.ReplicationPad2d.

    x: (N, C, H, W) array.  padding: (left, right, top, bottom) python ints >= 0.
    """
    assert x.ndim == 4 and len(padding) == 4
    left, right, top, bottom = (int(p) for p in padding)
    assert min(left, right, top, bottom) >= 0, "negative padding not supported"

    N, C, H, W = x.shape
    H_out = H + top + bottom
    W_out = W + left + right

    # Fuse N*C into one plane axis; each grid step handles TILE_NC full planes.
    NC = N * C
    x_planes = x.reshape(NC, H, W)

    itemsize = jnp.dtype(x.dtype).itemsize
    bytes_per_plane = (H * W + H_out * W_out) * itemsize
    # Budget for the double-buffered in+out blocks: 32 MiB — safe on v5e/v6e
    # (128 MiB physical) and v7x (64 MiB physical), below the 64 MiB limit set.
    vmem_budget = 32 * 1024 * 1024
    tile_nc = int(max(1, min(NC, vmem_budget // (2 * bytes_per_plane))))

    grid = (pl.cdiv(NC, tile_nc),)

    kernel = functools.partial(
        _replication_pad2d_kernel, padding=(left, right, top, bottom)
    )

    out = pl.pallas_call(
        kernel,
        out_shape=jax.ShapeDtypeStruct((NC, H_out, W_out), x.dtype),
        grid=grid,
        in_specs=[pl.BlockSpec((tile_nc, H, W), lambda i: (i, 0, 0))],
        out_specs=pl.BlockSpec((tile_nc, H_out, W_out), lambda i: (i, 0, 0)),
        compiler_params=pltpu.CompilerParams(
            dimension_semantics=("parallel",),
            vmem_limit_bytes=64 * 1024 * 1024,
        ),
    )(x_planes)

    return out.reshape(N, C, H_out, W_out)


class ReplicationPad2d:
    """Mirror of the PyTorch module (no parameters)."""

    def __init__(self, padding):
        assert isinstance(padding, (list, tuple)) and len(padding) == 4
        self.padding = tuple(int(p) for p in padding)

    def __call__(self, x):
        return replication_pad2d(x, self.padding)


if __name__ == "__main__":
    key = jax.random.PRNGKey(0)
    x = jax.random.normal(key, (2, 4, 16, 16), dtype=jnp.float32)

    padding = (1, 2, 3, 1)  # (left, right, top, bottom)
    pad = ReplicationPad2d(padding)

    out = jax.block_until_ready(pad(x))

    # Reference: jnp.pad with edge mode matches torch ReplicationPad2d.
    left, right, top, bottom = padding
    ref = jnp.pad(x, ((0, 0), (0, 0), (top, bottom), (left, right)), mode="edge")

    assert out.shape == (2, 4, 16 + top + bottom, 16 + left + right), out.shape
    assert out.dtype == x.dtype
    assert jnp.array_equal(out, ref), "mismatch vs reference edge pad"

    # Also exercise the zero-padding path.
    out0 = jax.block_until_ready(ReplicationPad2d((0, 0, 0, 0))(x))
    assert jnp.array_equal(out0, x)

    print("KERNEL_OK")
</pallas_src>

<mosaic_0001>
module attributes {stable_mosaic.version = 11 : i64} {
  func.func @_replication_pad2d_kernel(%arg0: i32, %arg1: memref<8x16x16xf32, #tpu.memory_space<vmem>>, %arg2: memref<8x20x19xf32, #tpu.memory_space<vmem>>) attributes {dimension_semantics = [#tpu.dimension_semantics<parallel>], iteration_bounds = array<i64: 1>, scalar_prefetch = 0 : i64, scratch_operands = 0 : i64, tpu.core_type = #tpu.core_type<tc>, window_params = [{transform_indices = @transform_0, window_bounds = array<i64: 8, 16, 16>}, {transform_indices = @transform_1, window_bounds = array<i64: 8, 20, 19>}]} {
    %c0 = arith.constant 0 : index
    %c0_0 = arith.constant 0 : index
    %c0_1 = arith.constant 0 : index
    %0 = vector.load %arg1[%c0, %c0_0, %c0_1] : memref<8x16x16xf32, #tpu.memory_space<vmem>>, vector<8x16x16xf32>
    %1 = vector.extract_strided_slice %0 {offsets = [0, 0, 0], sizes = [8, 16, 1], strides = [1, 1, 1]} : vector<8x16x16xf32> to vector<8x16x1xf32>
    %2 = vector.extract_strided_slice %0 {offsets = [0, 0, 15], sizes = [8, 16, 1], strides = [1, 1, 1]} : vector<8x16x16xf32> to vector<8x16x1xf32>
    %3 = vector.shape_cast %2 : vector<8x16x1xf32> to vector<8x16x1xf32>
    %4 = vector.broadcast %3 : vector<8x16x1xf32> to vector<8x16x2xf32>
    %5 = tpu.concatenate %1, %0, %4 in 2 : vector<8x16x1xf32>, vector<8x16x16xf32>, vector<8x16x2xf32> -> vector<8x16x19xf32>
    %6 = vector.extract_strided_slice %5 {offsets = [0, 0, 0], sizes = [8, 1, 19], strides = [1, 1, 1]} : vector<8x16x19xf32> to vector<8x1x19xf32>
    %7 = vector.shape_cast %6 : vector<8x1x19xf32> to vector<8x1x19xf32>
    %8 = vector.broadcast %7 : vector<8x1x19xf32> to vector<8x3x19xf32>
    %9 = vector.extract_strided_slice %5 {offsets = [0, 15, 0], sizes = [8, 1, 19], strides = [1, 1, 1]} : vector<8x16x19xf32> to vector<8x1x19xf32>
    %10 = tpu.concatenate %8, %5, %9 in 1 : vector<8x3x19xf32>, vector<8x16x19xf32>, vector<8x1x19xf32> -> vector<8x20x19xf32>
    %c0_2 = arith.constant 0 : index
    %c0_3 = arith.constant 0 : index
    %c0_4 = arith.constant 0 : index
    %11 = vector.load %arg2[%c0_2, %c0_3, %c0_4] : memref<8x20x19xf32, #tpu.memory_space<vmem>>, vector<8x20x19xf32>
    tpu.vector_store %arg2[%c0_2, %c0_3, %c0_4], %10 {strides = array<i32>} : memref<8x20x19xf32, #tpu.memory_space<vmem>>, vector<8x20x19xf32>,
    return
  }
  func.func @transform_0(%arg0: i32) -> (i32, i32, i32) {
    %c0_i32 = arith.constant 0 : i32
    %c0_i32_0 = arith.constant 0 : i32
    %c0_i32_1 = arith.constant 0 : i32
    return %arg0, %c0_i32, %c0_i32_0 : i32, i32, i32
  }
  func.func @transform_1(%arg0: i32) -> (i32, i32, i32) {
    %c0_i32 = arith.constant 0 : i32
    %c0_i32_0 = arith.constant 0 : i32
    %c0_i32_1 = arith.constant 0 : i32
    return %arg0, %c0_i32, %c0_i32_0 : i32, i32, i32
  }
}

</mosaic_0001>

<bundles_post_ra>
// kernel: tpu_custom_call.1
= control target key start
LH: loop header
LB: loop body
LE: loop exit
PB: predicated region body
PF: predicated region fallthrough
CT: control target
= control target key end

     0   :  { %6 = vsyncpa [#allocation3], 0  ;;  %s372_s9 = smov [#allocation2]   ;;  %s373_s11 = smov 128   ;;  %s664_s0 = inlined_call_operand.hbm [shape: f32[8,16,16], index: 0, kind: input, shape index: {}]   ;;  %s665_s1 = inlined_call_operand.vmem [shape: f32[8,20,19], index: 1, kind: output, shape index: {}]  }
   0x1   :  { %s11_s8 = sshll.u32 %s664_s0, 4  ;;  %s13_s10 = sshll.u32 %s372_s9, 4  ;;  %s12_s8 = int_to_ptr.hbm [resolvable:$true] %s11_s8  ;;  %s14_s10 = int_to_ptr.vmem [resolvable:$true] %s13_s10 }
   0x2   :  { %s374_s12 = smov 8  }
   0x3   :  { %19 = dma.hbm_to_vmem [thread:$0]  %s12_s8, 2048, %s14_s10, [#allocation3], %s373_s11, %s373_s11, %s374_s12  }
   0x4   :  { %370 = dma.done.wait [#allocation3], 2048  }
   0x5   :  { %371 = vsyncadd [#allocation3], 4294965248  ;;  %v375_v0 = vmov 15   ;;  %v390_v1 = vld [vmem:[#allocation2 + $0x20] sm:$0xff]  ;;  %v392_v2 = vld [vmem:[#allocation2 + $0x10] sm:$0xff]  ;;  %s376_s0 = smov 1  }
   0x6   :  { %345 = vset.pattern.permute.xlu2 %v375_v0  ;;  %344 = vset.pattern.permute.xlu1 %v375_v0  ;;  %v394_v3 = vld [vmem:[#allocation2] sm:$0xff]  ;;  %v399_v4 = vld [vmem:[#allocation2 + $0x28] sm:$0xff]  ;;  %v401_v5 = vld [vmem:[#allocation2 + $0x18] sm:$0xff]  ;;  %vm168_vm0 = vcmask 7168   ;;  %vm185_vm1 = vcmask 138240   ;;  %vm226_vm2 = vcmask 1042432  }
   0x7   :  { %343 = vset.pattern.permute.xlu0 %v375_v0  ;;  %62 = vperm.xlu2 %345, %v390_v1   ;;  %v25_v6 = vld [vmem:[#allocation2 + $0x8] sm:$0xff]  ;;  %v405_v7 = vld [vmem:[#allocation2 + $0x40] sm:$0xff]  ;;  %v407_v8 = vld [vmem:[#allocation2 + $0x38] sm:$0xff]  ;;  %vm310_vm3 = vcmask 150528   ;;  %vm307_vm4 = vcmask 154624  }
   0x8   :  { %52 = vperm.xlu1 %344, %v392_v2   ;;  %42 = vperm.xlu0 %343, %v394_v3   ;;  %v409_v9 = vld [vmem:[#allocation2 + $0x30] sm:$0xff]  ;;  %v414_v10 = vld [vmem:[#allocation2 + $0x58] sm:$0xff]  ;;  %v418_v12 = vld [vmem:[#allocation2 + $0x48] sm:$0xff] }
   0x9   :  { %v416_v11 = vld [vmem:[#allocation2 + $0x50] sm:$0xff]  ;;  %v425_v14 = vld [vmem:[#allocation2 + $0x68] sm:$0xff]  ;;  %v427_v15 = vld [vmem:[#allocation2 + $0x60] sm:$0xff] }
   0xa   :  { %v423_v13 = vld [vmem:[#allocation2 + $0x70] sm:$0xff]  ;;  %v432_v16 = vld [vmem:[#allocation2 + $0x78] sm:$0xff] }
   0xf   :  { %67 = vperm.xlu2 %345, %v399_v4  }
  0x10   :  { %57 = vperm.xlu1 %344, %v401_v5   ;;  %47 = vperm.xlu0 %343, %v25_v6  }
  0x17   :  { %82 = vperm.xlu2 %345, %v405_v7  }
  0x18   :  { %77 = vperm.xlu1 %344, %v407_v8   ;;  %72 = vperm.xlu0 %343, %v409_v9  }
  0x1f   :  { %97 = vperm.xlu2 %345, %v414_v10  }
  0x20   :  { %92 = vperm.xlu1 %344, %v416_v11   ;;  %87 = vperm.xlu0 %343, %v418_v12  }
  0x27   :  { %112 = vperm.xlu2 %345, %v423_v13  }
  0x28   :  { %107 = vperm.xlu1 %344, %v425_v14   ;;  %102 = vperm.xlu0 %343, %v427_v15  }
  0x2f   :  { %122 = vrot.lane.b32.xlu2 %v25_v6, %s376_s0 }
  0x30   :  { %120 = vrot.lane.b32.xlu1 %v394_v3, %s376_s0  ;;  %117 = vperm.xlu0 %343, %v432_v16  }
  0x37   :  { %128 = vrot.lane.b32.xlu2 %v390_v1, %s376_s0 }
  0x38   :  { %126 = vrot.lane.b32.xlu1 %v401_v5, %s376_s0  ;;  %124 = vrot.lane.b32.xlu0 %v392_v2, %s376_s0 }
  0x3f   :  { %134 = vrot.lane.b32.xlu2 %v407_v8, %s376_s0 }
  0x40   :  { %132 = vrot.lane.b32.xlu1 %v409_v9, %s376_s0  ;;  %130 = vrot.lane.b32.xlu0 %v399_v4, %s376_s0 }
  0x47   :  { %140 = vrot.lane.b32.xlu2 %v416_v11, %s376_s0 }
  0x48   :  { %138 = vrot.lane.b32.xlu1 %v418_v12, %s376_s0  ;;  %136 = vrot.lane.b32.xlu0 %v405_v7, %s376_s0 }
  0x4f   :  { %146 = vrot.lane.b32.xlu2 %v425_v14, %s376_s0 }
  0x50   :  { %144 = vrot.lane.b32.xlu1 %v427_v15, %s376_s0  ;;  %142 = vrot.lane.b32.xlu0 %v414_v10, %s376_s0 }
  0x58   :  { %150 = vrot.lane.b32.xlu1 %v432_v16, %s376_s0  ;;  %148 = vrot.lane.b32.xlu0 %v423_v13, %s376_s0 }
  0x61   :  { %v63_v17 = vpop.permute.xlu2 %62 }
  0x69   :  { %v450_v18 = vpop.permute.xlu2 %67 }
  0x71   :  { %v452_v19 = vpop.permute.xlu2 %82 }
  0x79   :  { %v454_v20 = vpop.permute.xlu2 %97 }
  0x7a   :  { %v456_v21 = vpop.permute.xlu1 %52  ;;  %v43_v22 = vpop.permute.xlu0 %42 }
  0x81   :  { %v458_v23 = vpop.permute.xlu2 %112 }
  0x82   :  { %v58_v24 = vpop.permute.xlu1 %57  ;;  %v48_v25 = vpop.permute.xlu0 %47 }
  0x89   :  { %v123_v27 = vpop.permute.xlu2 %122 }
  0x8a   :  { %v78_v26 = vpop.permute.xlu1 %77  ;;  %v170_v28 = vsel %vm168_vm0, %v25_v6, %v123_v27  ;;  %v461_v29 = vpop.permute.xlu0 %72 }
  0x8b   :  { %v187_v30 = vsel %vm185_vm1, %v170_v28, %v48_v25 }
  0x8c   :  { %v228_v31 = vrot.slane %v187_v30, 5  ;;  %v275_v32 = vrot.slane %v187_v30, 4 }
  0x8e   :  { %v299_v33 = vsel %vm226_vm2, %v228_v31, %v275_v32 }
  0x8f   :  { %311 = vst.msk [vmem:[%s665_s1 + $0x10] sm:$0xf] %vm310_vm3, %v299_v33 }
  0x91   :  { %v129_v35 = vpop.permute.xlu2 %128 }
  0x92   :  { %v93_v34 = vpop.permute.xlu1 %92  ;;  %v173_v36 = vsel %vm168_vm0, %v390_v1, %v129_v35  ;;  %v471_v37 = vpop.permute.xlu0 %87 }
  0x93   :  { %v474_v38 = vsel %vm185_vm1, %v173_v36, %v63_v17 }
  0x94   :  { %v204_v39 = vperm.slane %v474_v38, 0  ;;  %v233_v40 = vrot.slane %v474_v38, 5 }
  0x96   :  { %v293_v41 = vsel %vm226_vm2, %v204_v39, %v233_v40 }
  0x97   :  { %315 = vst.msk [vmem:[%s665_s1 + $0x30] sm:$0xff] %vm307_vm4, %v293_v41 }
  0x99   :  { %v135_v43 = vpop.permute.xlu2 %134 }
  0x9a   :  { %v108_v42 = vpop.permute.xlu1 %107  ;;  %v176_v44 = vsel %vm168_vm0, %v407_v8, %v135_v43  ;;  %v487_v45 = vpop.permute.xlu0 %102 }
  0x9b   :  { %v193_v46 = vsel %vm185_vm1, %v176_v44, %v78_v26 }
  0x9c   :  { %v237_v47 = vrot.slane %v193_v46, 5  ;;  %v278_v48 = vrot.slane %v193_v46, 4 }
  0x9e   :  { %v302_v49 = vsel %vm226_vm2, %v237_v47, %v278_v48 }
  0x9f   :  { %320 = vst.msk [vmem:[%s665_s1 + $0x58] sm:$0xf] %vm310_vm3, %v302_v49 }
  0xa1   :  { %v141_v50 = vpop.permute.xlu2 %140 }
  0xa2   :  { %v121_v51 = vpop.permute.xlu1 %120  ;;  %v179_v52 = vsel %vm168_vm0, %v416_v11, %v141_v50  ;;  %v499_v54 = vpop.permute.xlu0 %117 }
  0xa3   :  { %v169_v53 = vsel %vm168_vm0, %v394_v3, %v121_v51  ;;  %v502_v55 = vsel %vm185_vm1, %v179_v52, %v93_v34 }
  0xa4   :  { %v186_v56 = vsel %vm185_vm1, %v169_v53, %v43_v22  ;;  %v207_v57 = vperm.slane %v502_v55, 0  ;;  %v242_v58 = vrot.slane %v502_v55, 5 }
  0xa5   :  { %v202_v59 = vperm.slane %v186_v56, 0  ;;  %v227_v60 = vrot.slane %v186_v56, 5 }
  0xa6   :  { %v296_v61 = vsel %vm226_vm2, %v207_v57, %v242_v58 }
  0xa7   :  { %v229_v62 = vsel %vm226_vm2, %v227_v60, %v228_v31  ;;  %v291_v63 = vsel %vm226_vm2, %v202_v59, %v227_v60  ;;  %324 = vst.msk [vmem:[%s665_s1 + $0x78] sm:$0xff] %vm307_vm4, %v296_v61 }
  0xa8   :  { %308 = vst.msk [vmem:[%s665_s1] sm:$0xff] %vm307_vm4, %v291_v63 }
  0xa9   :  { %309 = vst.msk [vmem:[%s665_s1 + $0x8] sm:$0xff] %vm307_vm4, %v229_v62  ;;  %v147_v0 = vpop.permute.xlu2 %146 }
  0xaa   :  { %v127_v1 = vpop.permute.xlu1 %126  ;;  %v182_v3 = vsel %vm168_vm0, %v425_v14, %v147_v0  ;;  %v125_v8 = vpop.permute.xlu0 %124 }
  0xab   :  { %v172_v6 = vsel %vm168_vm0, %v401_v5, %v127_v1  ;;  %v529_v11 = vsel %vm185_vm1, %v182_v3, %v108_v42  ;;  %v171_v22 = vsel %vm168_vm0, %v392_v2, %v125_v8 }
  0xac   :  { %v189_v17 = vsel %vm185_vm1, %v172_v6, %v58_v24  ;;  %v246_v25 = vrot.slane %v529_v11, 5  ;;  %v281_v26 = vrot.slane %v529_v11, 4  ;;  %v188_v14 = vsel %vm185_vm1, %v171_v22, %v456_v21 }
  0xad   :  { %v231_v27 = vrot.slane %v189_v17, 5  ;;  %v276_v28 = vrot.slane %v189_v17, 4  ;;  %v203_v31 = vperm.slane %v188_v14, 0  ;;  %v230_v32 = vrot.slane %v188_v14, 5 }
  0xae   :  { %v305_v5 = vsel %vm226_vm2, %v246_v25, %v281_v26 }
  0xaf   :  { %v300_v30 = vsel %vm226_vm2, %v231_v27, %v276_v28  ;;  %329 = vst.msk [vmem:[%s665_s1 + $0xa0] sm:$0xf] %vm310_vm3, %v305_v5  ;;  %v232_v2 = vsel %vm226_vm2, %v230_v32, %v231_v27  ;;  %v292_v21 = vsel %vm226_vm2, %v203_v31, %v230_v32 }
  0xb0   :  { %314 = vst.msk [vmem:[%s665_s1 + $0x28] sm:$0xf] %vm310_vm3, %v300_v30 }
  0xb1   :  { %312 = vst.msk [vmem:[%s665_s1 + $0x18] sm:$0xff] %vm307_vm4, %v292_v21 }
  0xb2   :  { %v133_v24 = vpop.permute.xlu1 %132  ;;  %313 = vst.msk [vmem:[%s665_s1 + $0x20] sm:$0xff] %vm307_vm4, %v232_v2  ;;  %v131_v34 = vpop.permute.xlu0 %130 }
  0xb3   :  { %v175_v33 = vsel %vm168_vm0, %v409_v9, %v133_v24  ;;  %v174_v36 = vsel %vm168_vm0, %v399_v4, %v131_v34 }
  0xb4   :  { %v192_v35 = vsel %vm185_vm1, %v175_v33, %v461_v29  ;;  %v191_v42 = vsel %vm185_vm1, %v174_v36, %v450_v18 }
  0xb5   :  { %v205_v39 = vperm.slane %v192_v35, 0  ;;  %v236_v41 = vrot.slane %v192_v35, 5  ;;  %v234_v43 = vrot.slane %v191_v42, 5  ;;  %v277_v44 = vrot.slane %v191_v42, 4 }
  0xb7   :  { %v238_v46 = vsel %vm226_vm2, %v236_v41, %v237_v47  ;;  %v294_v48 = vsel %vm226_vm2, %v205_v39, %v236_v41  ;;  %v235_v4 = vsel %vm226_vm2, %v233_v40, %v234_v43  ;;  %v301_v9 = vsel %vm226_vm2, %v234_v43, %v277_v44 }
  0xb8   :  { %318 = vst.msk [vmem:[%s665_s1 + $0x48] sm:$0xff] %vm307_vm4, %v294_v48 }
  0xb9   :  { %319 = vst.msk [vmem:[%s665_s1 + $0x50] sm:$0xff] %vm307_vm4, %v238_v46 }
  0xba   :  { %316 = vst.msk [vmem:[%s665_s1 + $0x38] sm:$0xff] %vm307_vm4, %v235_v4  ;;  %v139_v18 = vpop.permute.xlu1 %138  ;;  %v137_v38 = vpop.permute.xlu0 %136 }
  0xbb   :  { %317 = vst.msk [vmem:[%s665_s1 + $0x40] sm:$0xf] %vm310_vm3, %v301_v9  ;;  %v178_v29 = vsel %vm168_vm0, %v418_v12, %v139_v18  ;;  %v177_v47 = vsel %vm168_vm0, %v405_v7, %v137_v38 }
  0xbc   :  { %v195_v40 = vsel %vm185_vm1, %v178_v29, %v471_v37  ;;  %v194_v51 = vsel %vm185_vm1, %v177_v47, %v452_v19 }
  0xbd   :  { %v240_v49 = vrot.slane %v195_v40, 5  ;;  %v279_v50 = vrot.slane %v195_v40, 4  ;;  %v206_v52 = vperm.slane %v194_v51, 0  ;;  %v239_v53 = vrot.slane %v194_v51, 5 }
  0xbf   :  { %v303_v56 = vsel %vm226_vm2, %v240_v49, %v279_v50  ;;  %v241_v12 = vsel %vm226_vm2, %v239_v53, %v240_v49  ;;  %v295_v37 = vsel %vm226_vm2, %v206_v52, %v239_v53 }
  0xc0   :  { %323 = vst.msk [vmem:[%s665_s1 + $0x70] sm:$0xf] %vm310_vm3, %v303_v56 }
  0xc1   :  { %321 = vst.msk [vmem:[%s665_s1 + $0x60] sm:$0xff] %vm307_vm4, %v295_v37 }
  0xc2   :  { %322 = vst.msk [vmem:[%s665_s1 + $0x68] sm:$0xff] %vm307_vm4, %v241_v12  ;;  %v145_v7 = vpop.permute.xlu1 %144  ;;  %v143_v57 = vpop.permute.xlu0 %142 }
  0xc3   :  { %v181_v19 = vsel %vm168_vm0, %v427_v15, %v145_v7  ;;  %v180_v60 = vsel %vm168_vm0, %v414_v10, %v143_v57 }
  0xc4   :  { %v198_v59 = vsel %vm185_vm1, %v181_v19, %v487_v45  ;;  %v197_v63 = vsel %vm185_vm1, %v180_v60, %v454_v20 }
  0xc5   :  { %v208_v61 = vperm.slane %v198_v59, 0  ;;  %v245_v62 = vrot.slane %v198_v59, 5  ;;  %v243_v0 = vrot.slane %v197_v63, 5  ;;  %v280_v1 = vrot.slane %v197_v63, 4 }
  0xc7   :  { %v247_v3 = vsel %vm226_vm2, %v245_v62, %v246_v25  ;;  %v297_v6 = vsel %vm226_vm2, %v208_v61, %v245_v62  ;;  %v244_v10 = vsel %vm226_vm2, %v242_v58, %v243_v0  ;;  %v304_v15 = vsel %vm226_vm2, %v243_v0, %v280_v1 }
  0xc8   :  { %327 = vst.msk [vmem:[%s665_s1 + $0x90] sm:$0xff] %vm307_vm4, %v297_v6 }
  0xc9   :  { %328 = vst.msk [vmem:[%s665_s1 + $0x98] sm:$0xff] %vm307_vm4, %v247_v3 }
  0xca   :  { %325 = vst.msk [vmem:[%s665_s1 + $0x80] sm:$0xff] %vm307_vm4, %v244_v10  ;;  %v151_v20 = vpop.permute.xlu1 %150  ;;  %v149_v55 = vpop.permute.xlu0 %148 }
  0xcb   :  { %326 = vst.msk [vmem:[%s665_s1 + $0x88] sm:$0xf] %vm310_vm3, %v304_v15  ;;  %v184_v45 = vsel %vm168_vm0, %v432_v16, %v151_v20  ;;  %v183_v8 = vsel %vm168_vm0, %v423_v13, %v149_v55 }
  0xcc   :  { %v201_v58 = vsel %vm185_vm1, %v184_v45, %v499_v54  ;;  %v200_v22 = vsel %vm185_vm1, %v183_v8, %v458_v23 }
  0xcd   :  { %v249_v11 = vrot.slane %v201_v58, 5  ;;  %v282_v17 = vrot.slane %v201_v58, 4  ;;  %v209_v25 = vperm.slane %v200_v22, 0  ;;  %v248_v26 = vrot.slane %v200_v22, 5 }
  0xcf   :  { %v306_v27 = vsel %vm226_vm2, %v249_v11, %v282_v17  ;;  %v250_v16 = vsel %vm226_vm2, %v248_v26, %v249_v11  ;;  %v298_v54 = vsel %vm226_vm2, %v209_v25, %v248_v26 }
  0xd0   :  { %332 = vst.msk [vmem:[%s665_s1 + $0xb8] sm:$0xf] %vm310_vm3, %v306_v27 }
  0xd1   :  { %330 = vst.msk [vmem:[%s665_s1 + $0xa8] sm:$0xff] %vm307_vm4, %v298_v54 }
  0xd2   :  { %331 = vst.msk [vmem:[%s665_s1 + $0xb0] sm:$0xff] %vm307_vm4, %v250_v16 }
  0xd3   :  { %337 = vsyncpa [#allocation3], 1 }

</bundles_post_ra>
